<compile_context>
chip_gen: v7x
topology: tpu7x:2x2x1
jax: 0.10.0
libtpu: 0.0.40
codegen_flags: <defaults>
</compile_context>

<pallas_src>
import math

import jax
import jax.numpy as jnp
from jax.experimental import pallas as pl
from jax.experimental.pallas import tpu as pltpu


def ffn_classifier_kernel(x_ref, w1_ref, b1_ref, w2_ref, b2_ref, o_ref):
    # In-kernel cast (VPU work hidden under DMA); x streams from HBM as f32.
    x = x_ref[...].astype(w1_ref.dtype)
    # Linear(dim, 16) on the folded, lane-dense layout (block-diagonal weights).
    h = jnp.dot(x, w1_ref[...], preferred_element_type=jnp.float32)
    h = jnp.maximum(h + b1_ref[...], 0.0)          # bias + ReLU in f32
    # Linear(16, out_dim); feed the MXU in the compute dtype, accumulate in f32.
    y = jnp.dot(h.astype(w2_ref.dtype), w2_ref[...],
                preferred_element_type=jnp.float32)
    o_ref[...] = (y + b2_ref[...]).astype(o_ref.dtype)


def feedforward_classifier(x, w1, b1, w2, b2, *,
                           block_rows=32768,
                           compute_dtype=jnp.bfloat16):
    """x: (N, dim); w1: (dim, 16); b1: (1,16)/(16,); w2: (16, out_dim); b2: (1,out_dim)/(out_dim,)."""
    n, dim = x.shape
    hidden = w1.shape[1]
    out_dim = w2.shape[1]
    orig_dtype = x.dtype

    b1 = jnp.asarray(b1, jnp.float32).reshape(1, hidden)
    b2 = jnp.asarray(b2, jnp.float32).reshape(1, out_dim)

    # Fold factor so the folded output minor dim (fold * out_dim) is a multiple of 128.
    fold = 128 // math.gcd(out_dim, 128)

    # Main body: largest multiple of `fold` rows (no full-array pad); tail via jnp epilogue.
    n_main = (n // fold) * fold
    n_tail = n - n_main

    outs = []
    if n_main > 0:
        n_f = n_main // fold
        dim_f, hid_f, out_f = fold * dim, fold * hidden, fold * out_dim

        # Lane-dense folded input view (free row-major reshape); stays f32 in HBM.
        x_f = x[:n_main].reshape(n_f, dim_f)

        # Block-diagonal weights (built once, tiny).  Hoist out of the per-call path
        # (or jit the whole wrapper) if calling repeatedly.
        eye = jnp.eye(fold, dtype=jnp.float32)
        w1_bd = jnp.kron(eye, w1.astype(jnp.float32)).astype(compute_dtype)   # (fold*dim, fold*hidden)
        w2_bd = jnp.kron(eye, w2.astype(jnp.float32)).astype(compute_dtype)   # (fold*hidden, fold*out_dim)
        b1_t = jnp.tile(b1, (1, fold))                                        # (1, fold*hidden)
        b2_t = jnp.tile(b2, (1, fold))                                        # (1, fold*out_dim)

        # Folded tile height: big tiles for pipelining (sublane multiple of 16 unless full).
        tm_f = max(16, ((block_rows // fold) // 16) * 16)
        if tm_f >= n_f:
            tm_f = n_f
        else:
            # v7x megacore: prefer an even number of grid steps so both TCs get work.
            n_blocks = -(-n_f // tm_f)
            if n_blocks % 2 == 1:
                cand = max(16, (((-(-n_f // (n_blocks + 1))) + 15) // 16) * 16)
                if cand < n_f:
                    tm_f = cand
        n_blocks = -(-n_f // tm_f)

        x_itemsize = jnp.dtype(x_f.dtype).itemsize
        out_itemsize = jnp.dtype(orig_dtype).itemsize
        w_itemsize = jnp.dtype(compute_dtype).itemsize

        # Cost estimate with the fold-inflated flops and the post-fix byte traffic.
        flops = int(2 * n_main * fold * (dim * hidden + hidden * out_dim))
        bytes_accessed = int(n_main * dim * x_itemsize
                             + (w1_bd.size + w2_bd.size) * w_itemsize
                             + (b1_t.size + b2_t.size) * 4
                             + n_f * out_f * out_itemsize)

        # VMEM working set (double-buffered x/out, resident weights); raise the scoped
        # limit only if needed, and never above ~48 MiB (v7x has 64 MiB per TC).
        vmem_est = (2 * tm_f * (dim_f * x_itemsize + out_f * out_itemsize)
                    + 2 * (w1_bd.size + w2_bd.size) * w_itemsize
                    + 2 * (b1_t.size + b2_t.size) * 4)
        vmem_limit = min(max(32 << 20, int(vmem_est * 2)), 48 << 20)

        y_f = pl.pallas_call(
            ffn_classifier_kernel,
            out_shape=jax.ShapeDtypeStruct((n_f, out_f), orig_dtype),
            grid_spec=pl.GridSpec(
                grid=(n_blocks,),
                in_specs=[
                    pl.BlockSpec((tm_f, dim_f), lambda i: (i, 0)),   # batch-tiled f32 stream
                    pl.BlockSpec((dim_f, hid_f), lambda i: (0, 0)),  # VMEM-resident weights
                    pl.BlockSpec((1, hid_f), lambda i: (0, 0)),
                    pl.BlockSpec((hid_f, out_f), lambda i: (0, 0)),
                    pl.BlockSpec((1, out_f), lambda i: (0, 0)),
                ],
                out_specs=pl.BlockSpec((tm_f, out_f), lambda i: (i, 0)),
            ),
            compiler_params=pltpu.CompilerParams(
                dimension_semantics=("parallel",),   # shard batch tiles across v7x's 2 TCs
                vmem_limit_bytes=vmem_limit,
            ),
            cost_estimate=pl.CostEstimate(flops=flops, transcendentals=0,
                                          bytes_accessed=bytes_accessed),
        )(x_f, w1_bd, b1_t, w2_bd, b2_t)
        outs.append(y_f.reshape(n_main, out_dim))

    if n_tail > 0:
        # Tiny (< fold rows) tail in plain f32 jnp -- cheaper than padding all of x.
        xt = x[n_main:].astype(jnp.float32)
        ht = jnp.maximum(jnp.dot(xt, w1.astype(jnp.float32), precision="highest") + b1, 0.0)
        yt = (jnp.dot(ht, w2.astype(jnp.float32), precision="highest") + b2).astype(orig_dtype)
        outs.append(yt)

    return outs[0] if len(outs) == 1 else jnp.concatenate(outs, axis=0)


def init_params(key, dim, out_dim, hidden=16):
    """Deterministic init mimicking PyTorch nn.Linear (uniform +/- 1/sqrt(fan_in))."""
    k1, k2, k3, k4 = jax.random.split(key, 4)
    bound1 = 1.0 / (dim ** 0.5)
    bound2 = 1.0 / (hidden ** 0.5)
    w1 = jax.random.uniform(k1, (dim, hidden), jnp.float32, -bound1, bound1)
    b1 = jax.random.uniform(k2, (1, hidden), jnp.float32, -bound1, bound1)
    w2 = jax.random.uniform(k3, (hidden, out_dim), jnp.float32, -bound2, bound2)
    b2 = jax.random.uniform(k4, (1, out_dim), jnp.float32, -bound2, bound2)
    return w1, b1, w2, b2


if __name__ == "__main__":
    key = jax.random.PRNGKey(0)
    kx, kp = jax.random.split(key)

    # Small shapes consistent with the module: dim=32 -> hidden 16 -> out_dim=8.
    # batch=520 (not a multiple of fold=16) exercises the multi-tile grid and the
    # tail-row epilogue.
    batch, dim, out_dim = 520, 32, 8
    x = jax.random.normal(kx, (batch, dim), jnp.float32)
    w1, b1, w2, b2 = init_params(kp, dim, out_dim)

    # Pure-JAX f32 reference.
    ref = jnp.dot(jnp.maximum(jnp.dot(x, w1, precision="highest") + b1, 0.0),
                  w2, precision="highest") + b2

    # 1) Structural check: f32 compute, small block_rows to force multiple grid
    #    steps (even count) plus the ragged tail.  (Tolerance covers MXU f32-pass
    #    rounding; any indexing/fold bug would be O(1) wrong.)
    out_f32 = feedforward_classifier(x, w1, b1, w2, b2,
                                     block_rows=256, compute_dtype=jnp.float32)
    out_f32 = jax.block_until_ready(out_f32)
    assert out_f32.shape == (batch, out_dim)
    assert jnp.allclose(out_f32, ref, atol=2e-2, rtol=2e-2)

    # 2) Default fast path: f32 streamed in, bf16 MXU inputs, f32 accumulation.
    out = feedforward_classifier(x, w1, b1, w2, b2)
    out = jax.block_until_ready(out)
    assert out.shape == (batch, out_dim)
    assert jnp.allclose(out, ref, atol=5e-2, rtol=5e-2)

    print("KERNEL_OK")
</pallas_src>

<mosaic_0001>
module attributes {stable_mosaic.version = 11 : i64} {
  func.func @ffn_classifier_kernel(%arg0: i32, %arg1: memref<16x512xf32, #tpu.memory_space<vmem>>, %arg2: memref<512x256xf32, #tpu.memory_space<vmem>>, %arg3: memref<1x256xf32, #tpu.memory_space<vmem>>, %arg4: memref<256x128xf32, #tpu.memory_space<vmem>>, %arg5: memref<1x128xf32, #tpu.memory_space<vmem>>, %arg6: memref<16x128xf32, #tpu.memory_space<vmem>>) attributes {dimension_semantics = [#tpu.dimension_semantics<parallel>], iteration_bounds = array<i64: 2>, scalar_prefetch = 0 : i64, scratch_operands = 0 : i64, tpu.core_type = #tpu.core_type<tc>, window_params = [{transform_indices = @transform_0, window_bounds = array<i64: 16, 512>}, {pipeline_mode = #tpu.pipeline_mode<synchronous>, transform_indices = @transform_1, window_bounds = array<i64: 512, 256>}, {pipeline_mode = #tpu.pipeline_mode<synchronous>, transform_indices = @transform_2, window_bounds = array<i64: 1, 256>}, {pipeline_mode = #tpu.pipeline_mode<synchronous>, transform_indices = @transform_3, window_bounds = array<i64: 256, 128>}, {pipeline_mode = #tpu.pipeline_mode<synchronous>, transform_indices = @transform_4, window_bounds = array<i64: 1, 128>}, {transform_indices = @transform_5, window_bounds = array<i64: 16, 128>}]} {
    %c0 = arith.constant 0 : index
    %c0_0 = arith.constant 0 : index
    %0 = vector.load %arg1[%c0, %c0_0] : memref<16x512xf32, #tpu.memory_space<vmem>>, vector<16x512xf32>
    %c0_1 = arith.constant 0 : index
    %c0_2 = arith.constant 0 : index
    %1 = vector.load %arg2[%c0_1, %c0_2] : memref<512x256xf32, #tpu.memory_space<vmem>>, vector<512x256xf32>
    %cst = arith.constant dense<0.000000e+00> : vector<16x256xf32>
    %2 = tpu.matmul %0, %1, %cst {dimension_numbers = #tpu.dot_dimension_numbers<[1], [0], [0], [1], [0, 0, 1, 1], [], []>} : vector<16x512xf32>, vector<512x256xf32>, vector<16x256xf32> -> vector<16x256xf32>
    %c0_3 = arith.constant 0 : index
    %c0_4 = arith.constant 0 : index
    %3 = vector.load %arg3[%c0_3, %c0_4] : memref<1x256xf32, #tpu.memory_space<vmem>>, vector<1x256xf32>
    %4 = vector.broadcast %3 : vector<1x256xf32> to vector<16x256xf32>
    %5 = arith.addf %2, %4 : vector<16x256xf32>
    %cst_5 = arith.constant 0.000000e+00 : f32
    %6 = vector.broadcast %cst_5 : f32 to vector<16x256xf32>
    %7 = arith.maximumf %5, %6 : vector<16x256xf32>
    %c0_6 = arith.constant 0 : index
    %c0_7 = arith.constant 0 : index
    %8 = vector.load %arg4[%c0_6, %c0_7] : memref<256x128xf32, #tpu.memory_space<vmem>>, vector<256x128xf32>
    %cst_8 = arith.constant dense<0.000000e+00> : vector<16x128xf32>
    %9 = tpu.matmul %7, %8, %cst_8 {dimension_numbers = #tpu.dot_dimension_numbers<[1], [0], [0], [1], [0, 0, 1, 1], [], []>} : vector<16x256xf32>, vector<256x128xf32>, vector<16x128xf32> -> vector<16x128xf32>
    %c0_9 = arith.constant 0 : index
    %c0_10 = arith.constant 0 : index
    %10 = vector.load %arg5[%c0_9, %c0_10] : memref<1x128xf32, #tpu.memory_space<vmem>>, vector<1x128xf32>
    %11 = vector.broadcast %10 : vector<1x128xf32> to vector<16x128xf32>
    %12 = arith.addf %9, %11 : vector<16x128xf32>
    %c0_11 = arith.constant 0 : index
    %c0_12 = arith.constant 0 : index
    %13 = vector.load %arg6[%c0_11, %c0_12] : memref<16x128xf32, #tpu.memory_space<vmem>>, vector<16x128xf32>
    tpu.vector_store %arg6[%c0_11, %c0_12], %12 {strides = array<i32>} : memref<16x128xf32, #tpu.memory_space<vmem>>, vector<16x128xf32>,
    return
  }
  func.func @transform_0(%arg0: i32) -> (i32, i32) {
    %c0_i32 = arith.constant 0 : i32
    %c0_i32_0 = arith.constant 0 : i32
    return %arg0, %c0_i32 : i32, i32
  }
  func.func @transform_1(%arg0: i32) -> (i32, i32) {
    %c0_i32 = arith.constant 0 : i32
    %c0_i32_0 = arith.constant 0 : i32
    %c0_i32_1 = arith.constant 0 : i32
    return %c0_i32, %c0_i32_0 : i32, i32
  }
  func.func @transform_2(%arg0: i32) -> (i32, i32) {
    %c0_i32 = arith.constant 0 : i32
    %c0_i32_0 = arith.constant 0 : i32
    %c0_i32_1 = arith.constant 0 : i32
    return %c0_i32, %c0_i32_0 : i32, i32
  }
  func.func @transform_3(%arg0: i32) -> (i32, i32) {
    %c0_i32 = arith.constant 0 : i32
    %c0_i32_0 = arith.constant 0 : i32
    %c0_i32_1 = arith.constant 0 : i32
    return %c0_i32, %c0_i32_0 : i32, i32
  }
  func.func @transform_4(%arg0: i32) -> (i32, i32) {
    %c0_i32 = arith.constant 0 : i32
    %c0_i32_0 = arith.constant 0 : i32
    %c0_i32_1 = arith.constant 0 : i32
    return %c0_i32, %c0_i32_0 : i32, i32
  }
  func.func @transform_5(%arg0: i32) -> (i32, i32) {
    %c0_i32 = arith.constant 0 : i32
    %c0_i32_0 = arith.constant 0 : i32
    return %arg0, %c0_i32 : i32, i32
  }
}

</mosaic_0001>

<bundles_post_ra>
// kernel: tpu_custom_call.1
= control target key start
LH: loop header
LB: loop body
LE: loop exit
PB: predicated region body
PF: predicated region fallthrough
CT: control target
= control target key end

     0   :  { %10 = vsyncpa [#allocation3], 0  ;;  %s1574_s0 = inlined_call_operand.hbm [shape: f32[32,512], index: 0, kind: input, shape index: {}]   ;;  %s1575_s1 = inlined_call_operand.hbm [shape: f32[512,256], index: 1, kind: input, shape index: {}]   ;;  %s1576_s2 = inlined_call_operand.vmem [shape: f32[1,256], index: 2, kind: input, shape index: {}]   ;;  %s1577_s3 = inlined_call_operand.hbm [shape: f32[256,128], index: 3, kind: input, shape index: {}]   ;;  %s1578_s4 = inlined_call_operand.vmem [shape: f32[1,128], index: 4, kind: input, shape index: {}]   ;;  %s1579_s5 = inlined_call_operand.hbm [shape: f32[32,128], index: 5, kind: output, shape index: {}]  }
   0x1   :  { %12 = vsyncpa [#allocation3 + $0x1], 0 }
   0x2   :  { %13 = vsyncpa [#allocation6], 0 }
   0x3   :  { %14 = vsyncpa [#allocation4], 0 }
   0x4   :  { %16 = vsyncpa [#allocation4 + $0x1], 0  ;;  %s1323_s18 = smov 0   ;;  %s1325_s19 = smov 0  }
   0x5   :  { %s1327_s20 = smov 0   ;;  %s1329_s21 = smov 0  }
   0x6 LB: > { %s1344_s22 = sadd.s32 4294967295, %s1279_s21   ;;  %s803_s23 = sadd.s32 4294967294, %s1279_s21   ;;  %s1279_s21 = sphi %s1329_s21, %s1599_s21   ;;  %s1275_s20 = sphi %s1327_s20, %s1598_s20   ;;  %s1271_s19 = sphi %s1325_s19, %s1597_s19   ;;  %s1267_s18 = sphi %s1323_s18, %s1596_s18  }
   0x7   : > { %p42_p0 = scmp.ne.s32.totalorder %s1271_s19, %s1267_s18  ;;  %p1580_p1 = scmp.eq.s32.totalorder %s1344_s22, 0 }
   0x8   : > { %p156_p3 = scmp.eq.s32.totalorder %s803_s23, 1  ;;  %p804_p5 = scmp.ge.s32.totalorder %s1279_s21, 1 }
   0x9   : > { %p1353_p4 = por %p1580_p1, %p42_p0  ;;  %p163_p7 = scmp.lt.s32.totalorder %s1279_s21, 3 }
   0xa   : > { %p1358_p6 = por %p156_p3, %p42_p0  ;;  %s1281_s27 = smov [#allocation5]  }
   0xb   : > { %s1583_s24 = scalar_select %p1353_p4, 1, 0 }
   0xc   : > { %s1584_s25 = scalar_select %p1358_p6, 1, 0 }
   0xd   : > { %p1363_p8 = pnand %p804_p5, %p163_p7  ;;  %s175_s28 = sshll.u32 %s1281_s27, 4  ;;  %s1367_s28 = int_to_ptr.vmem [resolvable:$true] %s175_s28 }
   0xe   : > { %s1282_s30 = smov [#allocation7]   ;;  %s1123_s9 = scalar_lea.hbm %s1575_s1, 16384 }
   0xf   : > { %p1060_p9 = pneg %p1363_p8  ;;  %s191_s6 = sshll.u32 %s1282_s30, 4  ;;  %s1378_s6 = int_to_ptr.vmem [resolvable:$true] %s191_s6 }
  0x10   : > { %p1124_p12 = scmp.ne.s32.totalorder %s1575_s1, %s1123_s9  ;;  %p1130_p5 = scmp.lt.u32.totalorder %s1123_s9, %s1575_s1 }
  0x11   : > { %p1374_p11 = pnand %p1060_p9, %p1580_p1 }
  0x13   : > { %p1125_p13 = pneg %p1374_p11 }
  0x15   : > { %p1126_p0 = pnand %p1125_p13, %p1124_p12 }
  0x17   : > { %p1127_p3 = pneg %p1126_p0 }
  0x19   : > { %p1132_p7 = pnand %p1130_p5, %p1127_p3 }
  0x1b   : > { %1135 = shalt.err (!%p1132_p7)
}
  0x1c   : > { %s1136_s14 = scalar_lea.vmem %s1367_s28, 16384  ;;  %p1144_p2 = scmp.lt.s32.totalorder %s1367_s28, %s1367_s28 }
  0x1d   : > { %p1137_p9 = scmp.ne.s32.totalorder %s1367_s28, %s1136_s14  ;;  %p1145_p12 = scmp.lt.s32.totalorder %s1136_s14, %s1136_s14 }
  0x1f   : > { %p1139_p10 = pnand %p1137_p9, %p1125_p13  ;;  %p1146_p0 = por %p1145_p12, %p1144_p2 }
  0x21   : > { %p1140_p1 = pneg %p1139_p10 }
  0x23   : > { %p1147_p6 = pnand %p1146_p0, %p1140_p1 }
  0x25   : > { %1150 = shalt.err (!%p1147_p6)
}
  0x26   : > { %s1283_s15 = smov 256   ;;  %s1284_s16 = smov 16  }
  0x27   : > { %1063 = dma.hbm_to_vmem [thread:$0]  (!%p1374_p11), %s1575_s1, 16384, %s1367_s28, [#allocation6], %s1283_s15, %s1283_s15, %s1284_s16  }
  0x28   : > { %s1151_s7 = scalar_lea.hbm %s1577_s3, 4096 }
  0x29   : > { %p1152_p2 = scmp.ne.s32.totalorder %s1577_s3, %s1151_s7  ;;  %p1158_p10 = scmp.lt.u32.totalorder %s1151_s7, %s1577_s3 }
  0x2b   : > { %p1154_p1 = pnand %p1152_p2, %p1125_p13 }
  0x2d   : > { %p1155_p6 = pneg %p1154_p1 }
  0x2f   : > { %p1160_p3 = pnand %p1158_p10, %p1155_p6 }
  0x31   : > { %1163 = shalt.err (!%p1160_p3)
}
  0x32   : > { %s1164_s28 = scalar_lea.vmem %s1378_s6, 4096  ;;  %p1172_p12 = scmp.lt.s32.totalorder %s1378_s6, %s1378_s6 }
  0x33   : > { %p1165_p5 = scmp.ne.s32.totalorder %s1378_s6, %s1164_s28  ;;  %p1173_p0 = scmp.lt.s32.totalorder %s1164_s28, %s1164_s28 }
  0x35   : > { %p1167_p7 = pnand %p1165_p5, %p1125_p13  ;;  %p1174_p2 = por %p1173_p0, %p1172_p12 }
  0x37   : > { %p1168_p9 = pneg %p1167_p7 }
  0x39   : > { %p1175_p1 = pnand %p1174_p2, %p1168_p9 }
  0x3b   : > { %1178 = shalt.err (!%p1175_p1)
}
  0x3c   : > { %s1285_s12 = smov 128   ;;  %s1286_s13 = smov 8  }
  0x3d   : > { %1066 = dma.hbm_to_vmem [thread:$0]  (!%p1374_p11), %s1577_s3, 4096, %s1378_s6, [#allocation6], %s1285_s12, %s1285_s12, %s1286_s13  }
  0x3e   : > { %s1433_s16 = sadd.s32 1, %s1279_s21   ;;  %s29_s23 = sadd.s32 1, %s1275_s20 }
  0x3f   : > { %s26_s17 = ssub.s32 %s1279_s21, %s1433_s16  ;;  %p36_p6 = scmp.ne.s32.totalorder %s1275_s20, %s1271_s19 }
  0x40   : > { %p27_p13 = scmp.eq.s32.totalorder %s26_s17, 0  ;;  %p37_p10 = scmp.eq.s32.totalorder %s1279_s21, 0 }
  0x41   : > { %p1587_p5 = scmp.eq.s32.totalorder %s1344_s22, 1  ;;  %p1077_p9 = scmp.lt.s32.totalorder %s1279_s21, 2 }
  0x42   : > { %s1442_s27 = scalar_select %p27_p13, %s1275_s20, %s29_s23  }
  0x43   : > { %p38_p3 = por %p37_p10, %p36_p6  ;;  %p1446_p7 = por %p1587_p5, %p36_p6 }
  0x44   : > { %s208_s29 = sand.u32 1, %s1275_s20   ;;  %s824_s6 = sshll.u32 %s1279_s21, 10 }
  0x45   : > { %s1588_s30 = scalar_select %p1446_p7, 1, 0 }
  0x46   : > { %s808_s7 = sshll.u32 %s208_s29, 6  ;;  %s1456_s10 = scalar_lea.hbm %s1574_s0, %s824_s6 }
  0x47   : > { %s212_s11 = scalar_lea.vmem [#allocation2], %s808_s7  ;;  %p1460_p11 = pnand %p1077_p9, %p38_p3 }
  0x48   : > { %s220_s28 = sshll.u32 %s212_s11, 4  ;;  %s1464_s13 = scalar_lea.sflag [#allocation3], %s208_s29  ;;  %s1458_s28 = int_to_ptr.vmem [resolvable:$true] %s220_s28 }
  0x49   : > { %s1179_s14 = scalar_lea.hbm %s1456_s10, 1024  ;;  %p1181_p0 = pneg %p1460_p11 }
  0x4a   : > { %p1180_p12 = scmp.ne.s32.totalorder %s1456_s10, %s1179_s14  ;;  %s1184_s23 = scalar_lea.hbm %s1574_s0, 2048 }
  0x4b   : > { %p1185_p13 = scmp.lt.u32.totalorder %s1456_s10, %s1574_s0  ;;  %p1186_p6 = scmp.lt.u32.totalorder %s1184_s23, %s1179_s14 }
  0x4c   : > { %p1182_p2 = pnand %p1181_p0, %p1180_p12  ;;  %p1188_p3 = scmp.lt.u32.totalorder %s1179_s14, %s1456_s10 }
  0x4d   : > { %p1187_p10 = por %p1186_p6, %p1185_p13 }
  0x4e   : > { %p1183_p1 = pneg %p1182_p2 }
  0x4f   : > { %p1189_p5 = por %p1188_p3, %p1187_p10 }
  0x51   : > { %p1190_p9 = pnand %p1189_p5, %p1183_p1 }
  0x53   : > { %1193 = shalt.err (!%p1190_p9)
}
  0x54   : > { %s1194_s29 = scalar_lea.vmem %s1458_s28, 1024  ;;  %s1287_s8 = smov [#allocation2]  }
  0x55   : > { %p1195_p12 = scmp.ne.s32.totalorder %s1458_s28, %s1194_s29  ;;  %s1199_s9 = sshll.u32 %s1287_s8, 4  ;;  %s1200_s9 = int_to_ptr.vmem [resolvable:$false] %s1199_s9 }
  0x56   : > { %s1201_s11 = scalar_lea.vmem %s1200_s9, 2048  ;;  %p1202_p4 = scmp.lt.s32.totalorder %s1458_s28, %s1200_s9 }
  0x57   : > { %p1197_p2 = pnand %p1195_p12, %p1181_p0  ;;  %p1203_p13 = scmp.lt.s32.totalorder %s1201_s11, %s1194_s29 }
  0x59   : > { %p1198_p7 = pneg %p1197_p2  ;;  %p1204_p6 = por %p1203_p13, %p1202_p4 }
  0x5b   : > { %p1205_p10 = pnand %p1204_p6, %p1198_p7 }
  0x5d   : > { %1208 = shalt.err (!%p1205_p10)
}
  0x5e   : > { %s1288_s14 = smov 512   ;;  %s1289_s15 = smov 32  }
  0x5f   : > { %1070 = dma.hbm_to_vmem [thread:$0]  (!%p1460_p11), %s1456_s10, 1024, %s1458_s28, %s1464_s13, %s1288_s14, %s1288_s14, %s1289_s15  }
  0x60   : > { %232 = sbr.rel (%p1363_p8) target bundleno = 630 (0x276), region = 40  ;;  %s1495_s17 = sand.u32 (!%p1363_p8), 1, %s1271_s19  }
  0x61   : > { %s813_s23 = sshll.u32 (!%p1363_p8), %s1495_s17, 6  ;;  %s235_s7 = scalar_lea.sflag (!%p1363_p8), [#allocation3], %s1495_s17 }
  0x62   : > { %s1499_s6 = scalar_lea.vmem (!%p1363_p8), [#allocation2], %s813_s23  ;;  %p1590_p4 = scmp.ne.s32.totalorder (!%p1363_p8), %s1583_s24, 0 }
  0x67   : > { %1254 = dma.done.wait (%p1590_p4), %s235_s7, 1024  }
  0x68   : > { %1256 = vsyncadd (%p1590_p4), %s235_s7, 4294966272  ;;  %p1591_p7 = scmp.eq.s32.totalorder %s1344_s22, 0 }
  0x6a   : > { %1258 = dma.done.wait (%p1591_p7), [#allocation6], 20480   ;;  %p1592_p8 = pmov %p1591_p7 }
  0x6b   : > { %v284_v0 = vld [vmem:[#allocation5 + $0x8] sm:$0xff]  ;;  %v286_v1 = vld [vmem:[#allocation5 + $0x18] sm:$0xff]  ;;  %v283_v2 = vld [vmem:[#allocation5] sm:$0xff]  ;;  %s816_s10 = sshll.u32 %s1495_s17, 4  ;;  %s825_s8 = sshll.u32 %s1344_s22, 8 }
  0x6c   : > { %1260 = vsyncadd (%p1592_p8), [#allocation6], 4294946816  ;;  %v864_v3 = vpack.c.bf16 %v286_v1, %v284_v0  ;;  %v285_v4 = vld [vmem:[#allocation5 + $0x10] sm:$0xff]  ;;  %v348_v5 = vld [vmem:[#allocation5 + $0x208] sm:$0xff]  ;;  %s272_s13 = scalar_lea.vmem [#allocation8], %s816_s10  ;;  %s1530_s14 = scalar_lea.hbm %s1579_s5, %s825_s8 }
  0x6d   : > { %v350_v6 = vld [vmem:[#allocation5 + $0x218] sm:$0xff]  ;;  %v866_v7 = vpack.c.bf16 %v285_v4, %v283_v2  ;;  %v347_v9 = vld [vmem:[#allocation5 + $0x200] sm:$0xff]  ;;  %v349_v10 = vld [vmem:[#allocation5 + $0x210] sm:$0xff]  ;;  %s711_s29 = sshll.u32 %s272_s13, 4  ;;  %s698_s15 = scalar_lea.sflag [#allocation4], %s1495_s17  ;;  %s1525_s29 = int_to_ptr.vmem [resolvable:$true] %s711_s29 }
  0x6e   : > { %v928_v8 = vpack.c.bf16 %v350_v6, %v348_v5  ;;  %v288_v11 = vld [vmem:[#allocation5 + $0x28] sm:$0xff]  ;;  %865 = vmatprep.subr.bf16.mxu1 %v864_v3  ;;  %v930_v12 = vpack.c.bf16 %v349_v10, %v347_v9  ;;  %v290_v13 = vld [vmem:[#allocation5 + $0x38] sm:$0xff]  ;;  %v287_v14 = vld [vmem:[#allocation5 + $0x20] sm:$0xff]  ;;  %s1209_s23 = scalar_lea.vmem %s1525_s29, 256  ;;  %p1593_p0 = scmp.ne.s32.totalorder %s1588_s30, 0 }
  0x6f   : > { %v289_v15 = vld [vmem:[#allocation5 + $0x30] sm:$0xff]  ;;  %867 = vmatpush1.bf16.msra.mxu1 %v866_v7  ;;  %v868_v16 = vpack.c.bf16 %v290_v13, %v288_v11  ;;  %v352_v18 = vld [vmem:[#allocation5 + $0x228] sm:$0xff]  ;;  %v354_v19 = vld [vmem:[#allocation5 + $0x238] sm:$0xff]  ;;  %p1210_p11 = scmp.ne.s32.totalorder %s1525_s29, %s1209_s23  ;;  %s1290_s22 = smov [#allocation8]  }
  0x70   : > { %929 = vmatprep.subr.bf16.mxu0 %v928_v8  ;;  %v870_v17 = vpack.c.bf16 %v289_v15, %v287_v14  ;;  %v351_v20 = vld [vmem:[#allocation5 + $0x220] sm:$0xff]  ;;  %v932_v21 = vpack.c.bf16 %v354_v19, %v352_v18  ;;  %v353_v22 = vld [vmem:[#allocation5 + $0x230] sm:$0xff]  ;;  %v292_v23 = vld [vmem:[#allocation5 + $0x48] sm:$0xff]  ;;  %s1213_s7 = sshll.u32 %s1290_s22, 4  ;;  %s1214_s7 = int_to_ptr.vmem [resolvable:$false] %s1213_s7 }
  0x71   : > { %931 = vmatpush1.bf16.msra.mxu0 %v930_v12  ;;  %v294_v24 = vld [vmem:[#allocation5 + $0x58] sm:$0xff]  ;;  %869 = vmatprep.subr.bf16.mxu1 %v868_v16  ;;  %v934_v25 = vpack.c.bf16 %v353_v22, %v351_v20  ;;  %v291_v27 = vld [vmem:[#allocation5 + $0x40] sm:$0xff]  ;;  %v293_v28 = vld [vmem:[#allocation5 + $0x50] sm:$0xff]  ;;  %p1211_p1 = pnand %p1210_p11, %p1593_p0  ;;  %p1216_p5 = scmp.lt.s32.totalorder %s1525_s29, %s1214_s7 }
  0x72   : > { %v872_v26 = vpack.c.bf16 %v294_v24, %v292_v23  ;;  %v356_v29 = vld [vmem:[#allocation5 + $0x248] sm:$0xff]  ;;  %933 = vmatprep.subr.bf16.mxu0 %v932_v21  ;;  %v358_v30 = vld [vmem:[#allocation5 + $0x258] sm:$0xff]  ;;  %v355_v31 = vld [vmem:[#allocation5 + $0x240] sm:$0xff]  ;;  %v874_v33 = vpack.c.bf16 %v293_v28, %v291_v27 }
  0x73   : > { %v357_v32 = vld [vmem:[#allocation5 + $0x250] sm:$0xff]  ;;  %871 = vmatpush1.bf16.msra.mxu1 %v870_v17  ;;  %v936_v34 = vpack.c.bf16 %v358_v30, %v356_v29  ;;  %v296_v35 = vld [vmem:[#allocation5 + $0x68] sm:$0xff]  ;;  %v298_v36 = vld [vmem:[#allocation5 + $0x78] sm:$0xff]  ;;  %p1212_p3 = pneg %p1211_p1 }
  0x74   : > { %v295_v37 = vld [vmem:[#allocation5 + $0x60] sm:$0xff]  ;;  %873 = vmatprep.subr.bf16.mxu1 %v872_v26  ;;  %v938_v38 = vpack.c.bf16 %v357_v32, %v355_v31  ;;  %v876_v39 = vpack.c.bf16 %v298_v36, %v296_v35  ;;  %v297_v40 = vld [vmem:[#allocation5 + $0x70] sm:$0xff]  ;;  %v360_v41 = vld [vmem:[#allocation5 + $0x268] sm:$0xff] }
  0x75   : > { %935 = vmatpush1.bf16.msra.mxu0 %v934_v25  ;;  %v362_v42 = vld [vmem:[#allocation5 + $0x278] sm:$0xff]  ;;  %v359_v44 = vld [vmem:[#allocation5 + $0x260] sm:$0xff]  ;;  %v361_v45 = vld [vmem:[#allocation5 + $0x270] sm:$0xff]  ;;  %v878_v48 = vpack.c.bf16 %v297_v40, %v295_v37 }
  0x76   : > { %937 = vmatprep.subr.bf16.mxu0 %v936_v34  ;;  %v940_v43 = vpack.c.bf16 %v362_v42, %v360_v41  ;;  %v300_v46 = vld [vmem:[#allocation5 + $0x88] sm:$0xff]  ;;  %v302_v47 = vld [vmem:[#allocation5 + $0x98] sm:$0xff]  ;;  %v942_v51 = vpack.c.bf16 %v361_v45, %v359_v44  ;;  %v299_v53 = vld [vmem:[#allocation5 + $0x80] sm:$0xff] }
  0x77   : > { %875 = vmatpush1.bf16.msra.mxu1 %v874_v33  ;;  %v364_v49 = vld [vmem:[#allocation5 + $0x288] sm:$0xff]  ;;  %v366_v50 = vld [vmem:[#allocation5 + $0x298] sm:$0xff]  ;;  %v880_v52 = vpack.c.bf16 %v302_v47, %v300_v46  ;;  %v301_v54 = vld [vmem:[#allocation5 + $0x90] sm:$0xff] }
  0x78   : > { %877 = vmatprep.subr.bf16.mxu1 %v876_v39  ;;  %v363_v55 = vld [vmem:[#allocation5 + $0x280] sm:$0xff]  ;;  %v944_v56 = vpack.c.bf16 %v366_v50, %v364_v49  ;;  %v365_v57 = vld [vmem:[#allocation5 + $0x290] sm:$0xff]  ;;  %v304_v58 = vld [vmem:[#allocation5 + $0xa8] sm:$0xff]  ;;  %v882_v62 = vpack.c.bf16 %v301_v54, %v299_v53 }
  0x79   : > { %939 = vmatpush1.bf16.msra.mxu0 %v938_v38  ;;  %v306_v59 = vld [vmem:[#allocation5 + $0xb8] sm:$0xff]  ;;  %v368_v60 = vld [vmem:[#allocation5 + $0x2a8] sm:$0xff]  ;;  %v946_v63 = vpack.c.bf16 %v365_v57, %v363_v55  ;;  %v303_v1 = vld [vmem:[#allocation5 + $0xa0] sm:$0xff] }
  0x7a   : > { %941 = vmatprep.subr.bf16.mxu0 %v940_v43  ;;  %v370_v61 = vld [vmem:[#allocation5 + $0x2b8] sm:$0xff]  ;;  %v884_v0 = vpack.c.bf16 %v306_v59, %v304_v58  ;;  %v305_v2 = vld [vmem:[#allocation5 + $0xb0] sm:$0xff]  ;;  %v367_v3 = vld [vmem:[#allocation5 + $0x2a0] sm:$0xff] }
  0x7b   : > { %879 = vmatpush1.bf16.msra.mxu1 %v878_v48  ;;  %v948_v4 = vpack.c.bf16 %v370_v61, %v368_v60  ;;  %v369_v5 = vld [vmem:[#allocation5 + $0x2b0] sm:$0xff]  ;;  %v308_v6 = vld [vmem:[#allocation5 + $0xc8] sm:$0xff]  ;;  %v310_v7 = vld [vmem:[#allocation5 + $0xd8] sm:$0xff]  ;;  %v886_v10 = vpack.c.bf16 %v305_v2, %v303_v1 }
  0x7c   : > { %881 = vmatprep.subr.bf16.mxu1 %v880_v52  ;;  %v372_v8 = vld [vmem:[#allocation5 + $0x2c8] sm:$0xff]  ;;  %v374_v9 = vld [vmem:[#allocation5 + $0x2d8] sm:$0xff]  ;;  %v950_v11 = vpack.c.bf16 %v369_v5, %v367_v3  ;;  %v888_v12 = vpack.c.bf16 %v310_v7, %v308_v6  ;;  %v307_v13 = vld [vmem:[#allocation5 + $0xc0] sm:$0xff] }
  0x7d   : > { %943 = vmatpush1.bf16.msra.mxu0 %v942_v51  ;;  %v309_v14 = vld [vmem:[#allocation5 + $0xd0] sm:$0xff]  ;;  %v371_v15 = vld [vmem:[#allocation5 + $0x2c0] sm:$0xff]  ;;  %v952_v16 = vpack.c.bf16 %v374_v9, %v372_v8  ;;  %v312_v18 = vld [vmem:[#allocation5 + $0xe8] sm:$0xff] }
  0x7e   : > { %945 = vmatprep.subr.bf16.mxu0 %v944_v56  ;;  %v373_v17 = vld [vmem:[#allocation5 + $0x2d0] sm:$0xff]  ;;  %v314_v19 = vld [vmem:[#allocation5 + $0xf8] sm:$0xff]  ;;  %v376_v20 = vld [vmem:[#allocation5 + $0x2e8] sm:$0xff]  ;;  %v890_v22 = vpack.c.bf16 %v309_v14, %v307_v13 }
  0x7f   : > { %883 = vmatpush1.bf16.msra.mxu1 %v882_v62  ;;  %v378_v21 = vld [vmem:[#allocation5 + $0x2f8] sm:$0xff]  ;;  %v954_v23 = vpack.c.bf16 %v373_v17, %v371_v15  ;;  %v892_v24 = vpack.c.bf16 %v314_v19, %v312_v18  ;;  %v311_v25 = vld [vmem:[#allocation5 + $0xe0] sm:$0xff]  ;;  %v313_v26 = vld [vmem:[#allocation5 + $0xf0] sm:$0xff] }
  0x80   : > { %885 = vmatprep.subr.bf16.mxu1 %v884_v0  ;;  %v375_v27 = vld [vmem:[#allocation5 + $0x2e0] sm:$0xff]  ;;  %v956_v28 = vpack.c.bf16 %v378_v21, %v376_v20  ;;  %v377_v29 = vld [vmem:[#allocation5 + $0x2f0] sm:$0xff]  ;;  %v316_v30 = vld [vmem:[#allocation5 + $0x108] sm:$0xff]  ;;  %v894_v34 = vpack.c.bf16 %v313_v26, %v311_v25 }
  0x81   : > { %947 = vmatpush1.bf16.msra.mxu0 %v946_v63  ;;  %v318_v31 = vld [vmem:[#allocation5 + $0x118] sm:$0xff]  ;;  %v380_v32 = vld [vmem:[#allocation5 + $0x308] sm:$0xff]  ;;  %v958_v35 = vpack.c.bf16 %v377_v29, %v375_v27  ;;  %v315_v37 = vld [vmem:[#allocation5 + $0x100] sm:$0xff] }
  0x82   : > { %949 = vmatprep.subr.bf16.mxu0 %v948_v4  ;;  %v382_v33 = vld [vmem:[#allocation5 + $0x318] sm:$0xff]  ;;  %v896_v36 = vpack.c.bf16 %v318_v31, %v316_v30  ;;  %v317_v38 = vld [vmem:[#allocation5 + $0x110] sm:$0xff]  ;;  %v379_v39 = vld [vmem:[#allocation5 + $0x300] sm:$0xff] }
  0x83   : > { %887 = vmatpush1.bf16.msra.mxu1 %v886_v10  ;;  %v960_v40 = vpack.c.bf16 %v382_v33, %v380_v32  ;;  %v381_v41 = vld [vmem:[#allocation5 + $0x310] sm:$0xff]  ;;  %v320_v42 = vld [vmem:[#allocation5 + $0x128] sm:$0xff]  ;;  %v322_v43 = vld [vmem:[#allocation5 + $0x138] sm:$0xff]  ;;  %v898_v46 = vpack.c.bf16 %v317_v38, %v315_v37 }
  0x84   : > { %889 = vmatprep.subr.bf16.mxu1 %v888_v12  ;;  %v384_v44 = vld [vmem:[#allocation5 + $0x328] sm:$0xff]  ;;  %v386_v45 = vld [vmem:[#allocation5 + $0x338] sm:$0xff]  ;;  %v962_v47 = vpack.c.bf16 %v381_v41, %v379_v39  ;;  %v900_v48 = vpack.c.bf16 %v322_v43, %v320_v42  ;;  %v319_v49 = vld [vmem:[#allocation5 + $0x120] sm:$0xff] }
  0x85   : > { %951 = vmatpush1.bf16.msra.mxu0 %v950_v11  ;;  %v321_v50 = vld [vmem:[#allocation5 + $0x130] sm:$0xff]  ;;  %v383_v51 = vld [vmem:[#allocation5 + $0x320] sm:$0xff]  ;;  %v964_v52 = vpack.c.bf16 %v386_v45, %v384_v44  ;;  %v324_v54 = vld [vmem:[#allocation5 + $0x148] sm:$0xff] }
  0x86   : > { %953 = vmatprep.subr.bf16.mxu0 %v952_v16  ;;  %v385_v53 = vld [vmem:[#allocation5 + $0x330] sm:$0xff]  ;;  %v326_v55 = vld [vmem:[#allocation5 + $0x158] sm:$0xff]  ;;  %v388_v56 = vld [vmem:[#allocation5 + $0x348] sm:$0xff]  ;;  %v902_v58 = vpack.c.bf16 %v321_v50, %v319_v49 }
  0x87   : > { %891 = vmatpush1.bf16.msra.mxu1 %v890_v22  ;;  %v390_v57 = vld [vmem:[#allocation5 + $0x358] sm:$0xff]  ;;  %v966_v59 = vpack.c.bf16 %v385_v53, %v383_v51  ;;  %v904_v60 = vpack.c.bf16 %v326_v55, %v324_v54  ;;  %v323_v61 = vld [vmem:[#allocation5 + $0x140] sm:$0xff]  ;;  %v325_v62 = vld [vmem:[#allocation5 + $0x150] sm:$0xff] }
  0x88   : > { %893 = vmatprep.subr.bf16.mxu1 %v892_v24  ;;  %v387_v63 = vld [vmem:[#allocation5 + $0x340] sm:$0xff]  ;;  %v968_v0 = vpack.c.bf16 %v390_v57, %v388_v56  ;;  %v389_v1 = vld [vmem:[#allocation5 + $0x350] sm:$0xff]  ;;  %v328_v2 = vld [vmem:[#allocation5 + $0x168] sm:$0xff]  ;;  %v906_v6 = vpack.c.bf16 %v325_v62, %v323_v61 }
  0x89   : > { %955 = vmatpush1.bf16.msra.mxu0 %v954_v23  ;;  %v330_v3 = vld [vmem:[#allocation5 + $0x178] sm:$0xff]  ;;  %v392_v4 = vld [vmem:[#allocation5 + $0x368] sm:$0xff]  ;;  %v327_v7 = vld [vmem:[#allocation5 + $0x160] sm:$0xff]  ;;  %v970_v8 = vpack.c.bf16 %v389_v1, %v387_v63 }
  0x8a   : > { %957 = vmatprep.subr.bf16.mxu0 %v956_v28  ;;  %v394_v5 = vld [vmem:[#allocation5 + $0x378] sm:$0xff]  ;;  %v908_v9 = vpack.c.bf16 %v330_v3, %v328_v2  ;;  %v329_v10 = vld [vmem:[#allocation5 + $0x170] sm:$0xff]  ;;  %v391_v11 = vld [vmem:[#allocation5 + $0x360] sm:$0xff] }
  0x8b   : > { %895 = vmatpush1.bf16.msra.mxu1 %v894_v34  ;;  %v393_v12 = vld [vmem:[#allocation5 + $0x370] sm:$0xff]  ;;  %v972_v13 = vpack.c.bf16 %v394_v5, %v392_v4  ;;  %v332_v14 = vld [vmem:[#allocation5 + $0x188] sm:$0xff]  ;;  %v334_v15 = vld [vmem:[#allocation5 + $0x198] sm:$0xff]  ;;  %v910_v20 = vpack.c.bf16 %v329_v10, %v327_v7 }
  0x8c   : > { %897 = vmatprep.subr.bf16.mxu1 %v896_v36  ;;  %v276_v16 = vld [vmem:[%s1499_s6 + $0x8] sm:$0xff]  ;;  %v398_v18 = vld [vmem:[#allocation5 + $0x398] sm:$0xff]  ;;  %v974_v21 = vpack.c.bf16 %v393_v12, %v391_v11  ;;  %v912_v22 = vpack.c.bf16 %v334_v15, %v332_v14  ;;  %v331_v23 = vld [vmem:[#allocation5 + $0x180] sm:$0xff] }
  0x8d   : > { %959 = vmatpush1.bf16.msra.mxu0 %v958_v35  ;;  %v396_v17 = vld [vmem:[#allocation5 + $0x388] sm:$0xff]  ;;  %487 = vmatprep.mubr.f32.mxu1 %v276_v16  ;;  %v278_v19 = vld [vmem:[%s1499_s6 + $0x18] sm:$0xff]  ;;  %v333_v24 = vld [vmem:[#allocation5 + $0x190] sm:$0xff] }
  0x8e   : > { %961 = vmatprep.subr.bf16.mxu0 %v960_v40  ;;  %564 = vmatprep.mubr.f32.mxu0 %v278_v19  ;;  %v395_v25 = vld [vmem:[#allocation5 + $0x380] sm:$0xff]  ;;  %v976_v26 = vpack.c.bf16 %v398_v18, %v396_v17  ;;  %v397_v27 = vld [vmem:[#allocation5 + $0x390] sm:$0xff]  ;;  %v336_v28 = vld [vmem:[#allocation5 + $0x1a8] sm:$0xff]  ;;  %v914_v32 = vpack.c.bf16 %v333_v24, %v331_v23 }
  0x8f   : > { %899 = vmatpush1.bf16.msra.mxu1 %v898_v46  ;;  %v338_v29 = vld [vmem:[#allocation5 + $0x1b8] sm:$0xff]  ;;  %v400_v30 = vld [vmem:[#allocation5 + $0x3a8] sm:$0xff]  ;;  %v978_v33 = vpack.c.bf16 %v397_v27, %v395_v25  ;;  %v335_v35 = vld [vmem:[#allocation5 + $0x1a0] sm:$0xff] }
  0x90   : > { %901 = vmatprep.subr.bf16.mxu1 %v900_v48  ;;  %v402_v31 = vld [vmem:[#allocation5 + $0x3b8] sm:$0xff]  ;;  %v916_v34 = vpack.c.bf16 %v338_v29, %v336_v28  ;;  %v337_v36 = vld [vmem:[#allocation5 + $0x1b0] sm:$0xff]  ;;  %v399_v37 = vld [vmem:[#allocation5 + $0x3a0] sm:$0xff] }
  0x91   : > { %963 = vmatpush1.bf16.msra.mxu0 %v962_v47  ;;  %v980_v38 = vpack.c.bf16 %v402_v31, %v400_v30  ;;  %v401_v39 = vld [vmem:[#allocation5 + $0x3b0] sm:$0xff]  ;;  %v340_v40 = vld [vmem:[#allocation5 + $0x1c8] sm:$0xff]  ;;  %v342_v41 = vld [vmem:[#allocation5 + $0x1d8] sm:$0xff]  ;;  %v918_v44 = vpack.c.bf16 %v337_v36, %v335_v35 }
  0x92   : > { %965 = vmatprep.subr.bf16.mxu0 %v964_v52  ;;  %v404_v42 = vld [vmem:[#allocation5 + $0x3c8] sm:$0xff]  ;;  %v406_v43 = vld [vmem:[#allocation5 + $0x3d8] sm:$0xff]  ;;  %v982_v45 = vpack.c.bf16 %v401_v39, %v399_v37  ;;  %v920_v46 = vpack.c.bf16 %v342_v41, %v340_v40  ;;  %v339_v47 = vld [vmem:[#allocation5 + $0x1c0] sm:$0xff] }
  0x93   : > { %903 = vmatpush1.bf16.msra.mxu1 %v902_v58  ;;  %v341_v48 = vld [vmem:[#allocation5 + $0x1d0] sm:$0xff]  ;;  %v403_v49 = vld [vmem:[#allocation5 + $0x3c0] sm:$0xff]  ;;  %v984_v50 = vpack.c.bf16 %v406_v43, %v404_v42  ;;  %v344_v52 = vld [vmem:[#allocation5 + $0x1e8] sm:$0xff] }
  0x94   : > { %905 = vmatprep.subr.bf16.mxu1 %v904_v60  ;;  %v405_v51 = vld [vmem:[#allocation5 + $0x3d0] sm:$0xff]  ;;  %v346_v53 = vld [vmem:[#allocation5 + $0x1f8] sm:$0xff]  ;;  %v408_v54 = vld [vmem:[#allocation5 + $0x3e8] sm:$0xff]  ;;  %v922_v56 = vpack.c.bf16 %v341_v48, %v339_v47 }
  0x95   : > { %967 = vmatpush1.bf16.msra.mxu0 %v966_v59  ;;  %v410_v55 = vld [vmem:[#allocation5 + $0x3f8] sm:$0xff]  ;;  %v986_v57 = vpack.c.bf16 %v405_v51, %v403_v49  ;;  %v924_v58 = vpack.c.bf16 %v346_v53, %v344_v52  ;;  %v343_v59 = vld [vmem:[#allocation5 + $0x1e0] sm:$0xff]  ;;  %v345_v60 = vld [vmem:[#allocation5 + $0x1f0] sm:$0xff] }
  0x96   : > { %969 = vmatprep.subr.bf16.mxu0 %v968_v0  ;;  %v988_v61 = vpack.c.bf16 %v410_v55, %v408_v54  ;;  %v407_v62 = vld [vmem:[#allocation5 + $0x3e0] sm:$0xff]  ;;  %v409_v63 = vld [vmem:[#allocation5 + $0x3f0] sm:$0xff]  ;;  %v598_v1 = vld [vmem:[#allocation7 + $0x88] sm:$0xff]  ;;  %v926_v2 = vpack.c.bf16 %v345_v60, %v343_v59 }
  0x97   : > { %907 = vmatpush1.bf16.msra.mxu1 %v906_v6  ;;  %v597_v0 = vld [vmem:[#allocation7 + $0x80] sm:$0xff]  ;;  %v990_v3 = vpack.c.bf16 %v409_v63, %v407_v62  ;;  %v582_v6 = vld [vmem:[#allocation7 + $0x8] sm:$0xff]  ;;  %v599_v7 = vld [vmem:[#allocation7 + $0x90] sm:$0xff] }
  0x98   : > { %909 = vmatprep.subr.bf16.mxu1 %v908_v9  ;;  %v992_v4 = vpack.c.bf16 %v598_v1, %v597_v0  ;;  %v581_v5 = vld [vmem:[#allocation7] sm:$0xff]  ;;  %v277_v10 = vld [vmem:[%s1499_s6 + $0x10] sm:$0xff]  ;;  %v280_v11 = vld [vmem:[%s1499_s6 + $0x28] sm:$0xff] }
  0x99   : > { %971 = vmatpush1.bf16.msra.mxu0 %v970_v8  ;;  %v600_v8 = vld [vmem:[#allocation7 + $0x98] sm:$0xff]  ;;  %v275_v9 = vld [vmem:[%s1499_s6] sm:$0xff]  ;;  %v994_v12 = vpack.c.bf16 %v582_v6, %v581_v5  ;;  %v583_v15 = vld [vmem:[#allocation7 + $0x10] sm:$0xff] }
  0x9a   : > { %973 = vmatprep.subr.bf16.mxu0 %v972_v13  ;;  %v282_v13 = vld [vmem:[%s1499_s6 + $0x38] sm:$0xff]  ;;  %v996_v14 = vpack.c.bf16 %v600_v8, %v599_v7  ;;  %v601_v17 = vld [vmem:[#allocation7 + $0xa0] sm:$0xff]  ;;  %v602_v18 = vld [vmem:[#allocation7 + $0xa8] sm:$0xff] }
  0x9b   : > { %911 = vmatpush1.bf16.msra.mxu1 %v910_v20  ;;  %v584_v16 = vld [vmem:[#allocation7 + $0x18] sm:$0xff]  ;;  %v279_v19 = vld [vmem:[%s1499_s6 + $0x20] sm:$0xff]  ;;  %v281_v20 = vld [vmem:[%s1499_s6 + $0x30] sm:$0xff]  ;;  %s1215_s6 = scalar_lea.vmem %s1214_s7, 512 }
  0x9c   : > { %913 = vmatprep.subr.bf16.mxu1 %v912_v22  ;;  %v1000_v22 = vpack.c.bf16 %v602_v18, %v601_v17  ;;  %v585_v23 = vld [vmem:[#allocation7 + $0x20] sm:$0xff]  ;;  %v586_v24 = vld [vmem:[#allocation7 + $0x28] sm:$0xff]  ;;  %v603_v25 = vld [vmem:[#allocation7 + $0xb0] sm:$0xff]  ;;  %p1217_p9 = scmp.lt.s32.totalorder %s1215_s6, %s1209_s23 }
  0x9d   : > { %975 = vmatpush1.bf16.msra.mxu0 %v974_v21  ;;  %v998_v21 = vpack.c.bf16 %v584_v16, %v583_v15  ;;  %v1002_v27 = vpack.c.bf16 %v586_v24, %v585_v23  ;;  %v587_v29 = vld [vmem:[#allocation7 + $0x30] sm:$0xff]  ;;  %v588_v30 = vld [vmem:[#allocation7 + $0x38] sm:$0xff]  ;;  %v605_v31 = vld [vmem:[#allocation7 + $0xc0] sm:$0xff] }
  0x9e   : > { %977 = vmatprep.subr.bf16.mxu0 %v976_v26  ;;  %v604_v26 = vld [vmem:[#allocation7 + $0xb8] sm:$0xff]  ;;  %v589_v35 = vld [vmem:[#allocation7 + $0x40] sm:$0xff]  ;;  %v590_v36 = vld [vmem:[#allocation7 + $0x48] sm:$0xff]  ;;  %p1218_p12 = por %p1217_p9, %p1216_p5 }
  0x9f   : > { %915 = vmatpush1.bf16.msra.mxu1 %v914_v32  ;;  %v1004_v28 = vpack.c.bf16 %v604_v26, %v603_v25  ;;  %v606_v32 = vld [vmem:[#allocation7 + $0xc8] sm:$0xff]  ;;  %v607_v37 = vld [vmem:[#allocation7 + $0xd0] sm:$0xff]  ;;  %v1010_v39 = vpack.c.bf16 %v590_v36, %v589_v35  ;;  %v592_v42 = vld [vmem:[#allocation7 + $0x58] sm:$0xff] }
  0xa0   : > { %917 = vmatprep.subr.bf16.mxu1 %v916_v34  ;;  %v1008_v34 = vpack.c.bf16 %v606_v32, %v605_v31  ;;  %v591_v41 = vld [vmem:[#allocation7 + $0x50] sm:$0xff]  ;;  %v593_v47 = vld [vmem:[#allocation7 + $0x60] sm:$0xff]  ;;  %v594_v48 = vld [vmem:[#allocation7 + $0x68] sm:$0xff]  ;;  %p1219_p2 = pnand %p1218_p12, %p1212_p3 }
  0xa1   : > { %979 = vmatpush1.bf16.msra.mxu0 %v978_v33  ;;  %v1006_v33 = vpack.c.bf16 %v588_v30, %v587_v29  ;;  %v1014_v43 = vpack.c.bf16 %v592_v42, %v591_v41  ;;  %v1018_v49 = vpack.c.bf16 %v594_v48, %v593_v47  ;;  %v612_v51 = vld [vmem:[#allocation7 + $0xf8] sm:$0xff]  ;;  %v595_v53 = vld [vmem:[#allocation7 + $0x70] sm:$0xff]  ;;  %v411_v59 = vld [vmem:[%s1576_s2] sm:$0x3] }
  0xa2   : > { %981 = vmatprep.subr.bf16.mxu0 %v980_v38  ;;  %v608_v38 = vld [vmem:[#allocation7 + $0xd8] sm:$0xff] }
  0xa3   : > { %919 = vmatpush1.bf16.msra.mxu1 %v918_v44  ;;  %v1012_v40 = vpack.c.bf16 %v608_v38, %v607_v37  ;;  %v609_v44 = vld [vmem:[#allocation7 + $0xe0] sm:$0xff]  ;;  %v596_v54 = vld [vmem:[#allocation7 + $0x78] sm:$0xff] }
  0xa4   : > { %921 = vmatprep.subr.bf16.mxu1 %v920_v46  ;;  %v1022_v55 = vpack.c.bf16 %v596_v54, %v595_v53 }
  0xa5   : > { %983 = vmatpush1.bf16.msra.mxu0 %v982_v45  ;;  %v610_v45 = vld [vmem:[#allocation7 + $0xe8] sm:$0xff] }
  0xa6   : > { %985 = vmatprep.subr.bf16.mxu0 %v984_v50  ;;  %v1016_v46 = vpack.c.bf16 %v610_v45, %v609_v44  ;;  %v611_v50 = vld [vmem:[#allocation7 + $0xf0] sm:$0xff] }
  0xa7   : > { %923 = vmatpush1.bf16.msra.mxu1 %v922_v56  ;;  %v1020_v52 = vpack.c.bf16 %v612_v51, %v611_v50  ;;  %v413_v56 = vlaneseq }
  0xa8   : > { %925 = vmatprep.subr.bf16.mxu1 %v924_v58 }
  0xa9   : > { %987 = vmatpush1.bf16.msra.mxu0 %v986_v57  ;;  %v414_v57 = vshrl.u32 %v413_v56, 7 }
  0xaa   : > { %989 = vmatprep.subr.bf16.mxu0 %v988_v61 }
  0xab   : > { %927 = vmatpush1.bf16.msra.mxu1 %v926_v2  ;;  %v415_v58 = vsub.s32 0, %v414_v57  ;;  %v419_v60 = vsub.s32 1, %v414_v57 }
  0xac   : > { %1024 = vmatprep.subr.bf16.mxu1 %v992_v4 }
  0xad   : > { %991 = vmatpush1.bf16.msra.mxu0 %v990_v3  ;;  %v416_v61 = vrot.slane %v411_v59, %v415_v58  ;;  %v420_v62 = vrot.slane %v411_v59, %v419_v60 }
  0xae   : > { %993 = vmatprep.subr.bf16.mxu0 %v992_v4  ;;  %488 = vmatmul.mubr.f32.vlgmr.msra.gmra.mrb[0].mxu1 %v275_v9 }
  0xaf   : > { %493 = vmatprep.mubr.f32.mxu1 %v280_v11  ;;  %1032 = vmatpush3.bf16.msra.mxu1 %v994_v12 }
  0xb0   : > { %565 = vmatmul.mubr.f32.vlgmr.msra.gmra.mrb[0].mxu0 %v277_v10  ;;  %1025 = vmatprep.subr.bf16.mxu1 %v996_v14 }
  0xb1   : > { %570 = vmatprep.mubr.f32.mxu0 %v282_v13  ;;  %995 = vmatpush3.bf16.msra.mxu0 %v994_v12 }
  0xb2   : > { %997 = vmatprep.subr.bf16.mxu0 %v996_v14  ;;  %494 = vmatmul.mubr.f32.gmra.mrb[2].mxu1 %v279_v19 }
  0xb3   : > { %1033 = vmatpush3.bf16.msra.mxu1 %v998_v21 }
  0xb4   : > { %571 = vmatmul.mubr.f32.gmra.mrb[2].mxu0 %v281_v20  ;;  %1026 = vmatprep.subr.bf16.mxu1 %v1000_v22  ;;  %v817_v20 = vld [vmem:[%s1578_s4] ss:$0 sm:$0xff] }
  0xb5   : > { %999 = vmatpush3.bf16.msra.mxu0 %v998_v21 }
  0xb6   : > { %1001 = vmatprep.subr.bf16.mxu0 %v1000_v22 }
  0xb7   : > { %1034 = vmatpush3.bf16.msra.mxu1 %v1002_v27 }
  0xb8   : > { %1027 = vmatprep.subr.bf16.mxu1 %v1004_v28 }
  0xb9   : > { %1003 = vmatpush3.bf16.msra.mxu0 %v1002_v27 }
  0xba   : > { %1005 = vmatprep.subr.bf16.mxu0 %v1004_v28 }
  0xbb   : > { %1035 = vmatpush3.bf16.msra.mxu1 %v1006_v33 }
  0xbc   : > { %1028 = vmatprep.subr.bf16.mxu1 %v1008_v34 }
  0xbd   : > { %1007 = vmatpush3.bf16.msra.mxu0 %v1006_v33 }
  0xbe   : > { %1009 = vmatprep.subr.bf16.mxu0 %v1008_v34 }
  0xbf   : > { %1036 = vmatpush3.bf16.msra.mxu1 %v1010_v39 }
  0xc0   : > { %1029 = vmatprep.subr.bf16.mxu1 %v1012_v40 }
  0xc1   : > { %1011 = vmatpush3.bf16.msra.mxu0 %v1010_v39 }
  0xc2   : > { %1013 = vmatprep.subr.bf16.mxu0 %v1012_v40 }
  0xc3   : > { %1037 = vmatpush3.bf16.msra.mxu1 %v1014_v43 }
  0xc4   : > { %1030 = vmatprep.subr.bf16.mxu1 %v1016_v46 }
  0xc5   : > { %1015 = vmatpush3.bf16.msra.mxu0 %v1014_v43 }
  0xc6   : > { %1017 = vmatprep.subr.bf16.mxu0 %v1016_v46 }
  0xc7   : > { %1038 = vmatpush3.bf16.msra.mxu1 %v1018_v49 }
  0xc8   : > { %1031 = vmatprep.subr.bf16.mxu1 %v1020_v52 }
  0xc9   : > { %1019 = vmatpush3.bf16.msra.mxu0 %v1018_v49 }
  0xca   : > { %1021 = vmatprep.subr.bf16.mxu0 %v1020_v52 }
  0xcb   : > { %1039 = vmatpush3.bf16.msra.mxu1 %v1022_v55 }
  0xcd   : > { %1023 = vmatpush3.bf16.msra.mxu0 %v1022_v55 }
 0x181   : > { %v489_v63 = vpop.f32.mrb[0].mxu1 }
 0x182   : > { %v490_v0 = vadd.f32 %v489_v63, %v416_v61  ;;  %v491_v1 = vpop.f32.mrb[1].mxu1 }
 0x183   : > { %v566_v2 = vpop.f32.mrb[0].mxu0  ;;  %v492_v3 = vadd.f32 %v491_v1, %v420_v62 }
 0x184   : > { %v568_v4 = vpop.f32.mrb[1].mxu0  ;;  %v567_v5 = vadd.f32 %v566_v2, %v490_v0 }
 0x185   : > { %v569_v6 = vadd.f32 %v568_v4, %v492_v3  ;;  %v495_v7 = vpop.f32.mrb[2].mxu1 }
 0x186   : > { %v496_v8 = vadd.f32 %v495_v7, %v416_v61  ;;  %v497_v9 = vpop.f32.mrb[3].mxu1  ;;  %v577_v14 = vmax.f32 %v567_v5, 0.0 }
 0x187   : > { %v572_v10 = vpop.f32.mrb[2].mxu0  ;;  %v578_v11 = vmax.f32 %v569_v6, 0.0  ;;  %v498_v12 = vadd.f32 %v497_v9, %v420_v62 }
 0x188   : > { %v574_v13 = vpop.f32.mrb[3].mxu0  ;;  %v573_v15 = vadd.f32 %v572_v10, %v496_v8 }
 0x189   : > { %v575_v16 = vadd.f32 %v574_v13, %v498_v12  ;;  %684 = vmatprep.mubr.f32.mxu0 %v578_v11 }
 0x18a   : > { %685 = vmatmul.mubr.f32.vlgmr.msra.gmra.mrb[4].mxu0 %v577_v14  ;;  %v579_v18 = vmax.f32 %v573_v15, 0.0 }
 0x18b   : > { %v580_v17 = vmax.f32 %v575_v16, 0.0 }
 0x18d   : > { %689 = vmatprep.mubr.f32.mxu1 %v580_v17 }
 0x18e   : > { %690 = vmatmul.mubr.f32.vlgmr.msra.gmra.mrb[4].mxu1 %v579_v18 }
 0x25d   : > { %v858_v19 = vpop.f32.mrb[4].mxu0 }
 0x25e   : > { %v859_v21 = vpop.f32.mrb[5].mxu0 }
 0x25f   : > { %v860_v22 = vadd.f32 %v859_v21, %v858_v19 }
 0x261   : > { %v687_v23 = vadd.f32 %v860_v22, %v817_v20  ;;  %v861_v24 = vpop.f32.mrb[4].mxu1 }
 0x262   : > { %v862_v25 = vpop.f32.mrb[5].mxu1 }
 0x263   : > { %695 = vst [vmem:[%s272_s13] sm:$0xff] %v687_v23  ;;  %v863_v26 = vadd.f32 %v862_v25, %v861_v24 }
 0x265   : > { %v692_v27 = vadd.f32 %v863_v26, %v817_v20 }
 0x267   : > { %696 = vst [vmem:[%s272_s13 + $0x8] sm:$0xff] %v692_v27 }
 0x268   : > { %1222 = shalt.err (!%p1219_p2)
}
 0x269   : > { %s1223_s24 = scalar_lea.hbm %s1530_s14, 256  ;;  %s1227_s28 = scalar_lea.hbm %s1579_s5, 512 }
 0x26a   : > { %p1224_p13 = scmp.ne.s32.totalorder %s1530_s14, %s1223_s24  ;;  %p1228_p4 = scmp.lt.u32.totalorder %s1530_s14, %s1579_s5 }
 0x26b   : > { %p1229_p7 = scmp.lt.u32.totalorder %s1227_s28, %s1223_s24  ;;  %p1231_p11 = scmp.lt.u32.totalorder %s1223_s24, %s1530_s14 }
 0x26c   : > { %p1225_p6 = pnand %p1224_p13, %p1593_p0 }
 0x26d   : > { %p1230_p8 = por %p1229_p7, %p1228_p4 }
 0x26e   : > { %p1226_p10 = pneg %p1225_p6 }
 0x26f   : > { %p1232_p1 = por %p1231_p11, %p1230_p8 }
 0x271   : > { %p1233_p3 = pnand %p1232_p1, %p1226_p10 }
 0x273   : > { %1236 = shalt.err (!%p1233_p3)
}
 0x274   : > { %s1291_s8 = smov 128   ;;  %s1292_s9 = smov 8  }
 0x275   : > { %1058 = dma.vmem_to_hbm [thread:$0]  (%p1593_p0), %s1525_s29, 256, %s1530_s14, %s698_s15, %s1291_s8, %s1291_s8, %s1292_s9  }
 0x276 PF: > { %s726_s11 = sand.u32 1, %s1267_s18   ;;  %p1594_p5 = scmp.ne.s32.totalorder %s1584_s25, 0 }
 0x277   : > { %p1595_p9 = scmp.ge.s32.totalorder %s1279_s21, 2  ;;  %s727_s23 = scalar_lea.sflag [#allocation4], %s726_s11 }
 0x279   : > { %p1072_p12 = pnand %p1595_p9, %p1594_p5 }
 0x27b   : > { %1262 = dma.done.wait (!%p1072_p12), %s727_s23, 256  }
 0x27c   : > { %1264 = vsyncadd (!%p1072_p12), %s727_s23, 4294967040  ;;  %p19_p2 = scmp.ge.s32.totalorder %s1433_s16, 4   ;;  %s1596_s18 = smov %s1271_s19 }
 0x27d   : > { %s1597_s19 = smov %s1275_s20  ;;  %s1598_s20 = smov %s1442_s27 }
 0x27e   : > { %s1599_s21 = smov %s1433_s16  ;;  %21 = sbr.rel (!%p19_p2) target bundleno = 6 (0x6), region = 93 }
 0x285   :  { %732 = vsyncpa [#allocation3], 1 }
 0x286   :  { %734 = vsyncpa [#allocation3 + $0x1], 1 }
 0x287   :  { %735 = vsyncpa [#allocation6], 1 }
 0x288   :  { %736 = vsyncpa [#allocation4], 1 }
 0x289   :  { %738 = vsyncpa [#allocation4 + $0x1], 1 }

</bundles_post_ra>
